<compile_context>
chip_gen: v7x
topology: tpu7x:2x2x1
jax: 0.10.0
libtpu: 0.0.40
codegen_flags: <defaults>
</compile_context>

<pallas_src>
import functools
import math

import jax
import jax.numpy as jnp
from jax.experimental import pallas as pl
from jax.experimental.pallas import tpu as pltpu


_DEFAULT_OUT_DTYPE = jnp.bfloat16


def _round_up(x, m):
    return (x + m - 1) // m * m


# ---------------------------------------------------------------------------
# Kernel: FCBlock MLP for one (layer, batch tile, N tile) grid point.
#   refs = (x, w0, b0, ..., w_{H-1}, b_{H-1}, w_last, b_last, out, h_scratch)
#   Trunk (hidden layers, Linear+ReLU) is computed only at j == 0 per
#   (layer, batch tile) and cached in h_scratch (bf16).
# ---------------------------------------------------------------------------
def _hyper_mlp_kernel(*refs, num_hidden):
    x_ref = refs[0]
    w_last_ref = refs[1 + 2 * num_hidden]
    b_last_ref = refs[2 + 2 * num_hidden]
    out_ref = refs[3 + 2 * num_hidden]
    h_ref = refs[4 + 2 * num_hidden]

    @pl.when(pl.program_id(2) == 0)
    def _():
        h = x_ref[...]                                       # bf16 [tile_b, in_f]
        for i in range(num_hidden):
            w = refs[1 + 2 * i][0]                           # bf16 [fan_in, fan_out]
            b = refs[2 + 2 * i][0].astype(jnp.float32)       # f32  [1, fan_out]
            a = jnp.dot(h, w, preferred_element_type=jnp.float32)
            h = jnp.maximum(a + b, 0.0).astype(jnp.bfloat16)  # bias+ReLU in f32
        h_ref[...] = h                                       # cache trunk output

    # Last (outermost-linear) layer, streamed N slab.
    out = jnp.dot(h_ref[...], w_last_ref[0],
                  preferred_element_type=jnp.float32)
    out = out + b_last_ref[0].astype(jnp.float32)
    out_ref[0] = out.astype(out_ref.dtype)


def _vmem_cap_bytes():
    """Generation-aware VMEM cap (physical minus headroom for compiler scratch)."""
    try:
        phys = int(pltpu.get_tpu_info().vmem_capacity_bytes)
    except Exception:
        phys = 64 << 20          # conservative fallback (v7x size)
    if phys >= (100 << 20):      # v5e / v6e: 128 MiB physical
        return 100 << 20
    return max(phys - (16 << 20), 32 << 20)   # v7x: ~48 MiB usable


def fcblock_group_forward_pallas(x, stacked_params, *, tile_b=None, tile_n=None,
                                 out_dtype=_DEFAULT_OUT_DTYPE):
    """FCBlock MLP for L identically-shaped layers in one launch.

    x:              [B, in_features]
    stacked_params: list of (w [L, fan_in, fan_out] (bf16), b [L, 1, fan_out] (f32)),
                    ReLU after every layer except the last (outermost linear).
    returns:        [L, B, total_out] in out_dtype.
    """
    num_layers = len(stacked_params)
    num_hidden = num_layers - 1
    L = stacked_params[0][0].shape[0]
    B, in_features = x.shape
    hidden_ch = stacked_params[-1][0].shape[1]     # trunk width (fan_in of last layer)
    total_out = stacked_params[-1][0].shape[2]
    out_itemsize = jnp.dtype(out_dtype).itemsize

    vmem_cap = _vmem_cap_bytes()

    # ---- batch tile -------------------------------------------------------
    tile_b_user = tile_b
    if tile_b is None:
        tile_b = min(512, _round_up(B, 8))
        if L == 1 and B >= 512:
            # keep >= 2 batch tiles so v7x's 2nd TensorCore gets work
            tile_b = 256
    tile_b = max(8, min(_round_up(tile_b, 8), _round_up(B, 8)))

    # ---- resident VMEM (trunk params + x block + trunk scratch) ------------
    resident = 0
    for (w, b) in stacked_params[:-1]:
        resident += 2 * (w.shape[1] * w.shape[2] * w.dtype.itemsize
                         + b.shape[1] * b.shape[2] * b.dtype.itemsize)
    resident += 2 * tile_b * in_features * 2       # x block (bf16), double-buffered
    resident += tile_b * hidden_ch * 2             # trunk cache scratch (bf16)

    # ---- N tile: big, lane-dense, low padding waste, fits the VMEM cap -----
    n128 = _round_up(total_out, 128)
    per_n_col = 2 * (hidden_ch * 2 + 4 + tile_b * out_itemsize)   # streamed bytes / column
    if tile_n is None:
        budget = vmem_cap - resident - (8 << 20)
        max_tile_n = max(128, min(4096, budget // max(per_n_col, 1)))
        max_tile_n = (max_tile_n // 128) * 128
        if n128 <= max_tile_n:
            tile_n = n128
        else:
            best = None
            k_max = max_tile_n // 128
            for k in range(k_max, max(k_max // 2, 1) - 1, -1):
                cand = k * 128
                waste = _round_up(total_out, cand) - total_out
                score = (waste, -cand)
                if best is None or score < best[0]:
                    best = (score, cand)
            tile_n = best[1]
    tile_n = min(_round_up(tile_n, 128), n128)

    b_pad = _round_up(B, tile_b)
    n_pad = _round_up(total_out, tile_n)
    grid = (L, b_pad // tile_b, n_pad // tile_n)

    # ---- pad / cast inputs (padding sliced off afterwards) ------------------
    x_p = x.astype(jnp.bfloat16)
    if b_pad != B:
        x_p = jnp.pad(x_p, ((0, b_pad - B), (0, 0)))
    w_last, b_last = stacked_params[-1]
    if n_pad != total_out:
        w_last = jnp.pad(w_last, ((0, 0), (0, 0), (0, n_pad - total_out)))
        b_last = jnp.pad(b_last, ((0, 0), (0, 0), (0, n_pad - total_out)))

    # ---- specs --------------------------------------------------------------
    flat_args = [x_p]
    in_specs = [pl.BlockSpec((tile_b, in_features), lambda l, i, j: (i, 0))]
    for (w, b) in stacked_params[:-1]:
        flat_args += [w, b]
        in_specs += [pl.BlockSpec((1,) + w.shape[1:], lambda l, i, j: (l, 0, 0)),
                     pl.BlockSpec((1,) + b.shape[1:], lambda l, i, j: (l, 0, 0))]
    flat_args += [w_last, b_last]
    in_specs += [pl.BlockSpec((1, hidden_ch, tile_n), lambda l, i, j: (l, 0, j)),
                 pl.BlockSpec((1, 1, tile_n), lambda l, i, j: (l, 0, j))]

    out_shape = jax.ShapeDtypeStruct((L, b_pad, n_pad), out_dtype)
    out_spec = pl.BlockSpec((1, tile_b, tile_n), lambda l, i, j: (l, i, j))

    # ---- VMEM budget / compiler params --------------------------------------
    vmem_needed = resident + per_n_col * tile_n + (1 << 20)
    cp_kwargs = dict(dimension_semantics=("parallel", "parallel", "arbitrary"))
    if vmem_needed > (24 << 20):
        cp_kwargs["vmem_limit_bytes"] = int(min(vmem_needed + (8 << 20), vmem_cap))

    # ---- cost estimate (last-layer matmul + trunk, streamed bytes) ----------
    flops = 0
    prev = in_features
    for (w, _) in stacked_params:
        fan_out = w.shape[2]
        flops += 2 * L * b_pad * prev * fan_out
        prev = fan_out
    bytes_accessed = (x_p.size * x_p.dtype.itemsize
                      + sum(w.size * w.dtype.itemsize + b.size * b.dtype.itemsize
                            for (w, b) in stacked_params)
                      + L * b_pad * n_pad * out_itemsize)
    cost = pl.CostEstimate(flops=int(flops), transcendentals=0,
                           bytes_accessed=int(bytes_accessed))

    kernel = functools.partial(_hyper_mlp_kernel, num_hidden=num_hidden)
    out = pl.pallas_call(
        kernel,
        out_shape=out_shape,
        grid=grid,
        in_specs=in_specs,
        out_specs=out_spec,
        scratch_shapes=[pltpu.VMEM((tile_b, hidden_ch), jnp.bfloat16)],
        compiler_params=pltpu.CompilerParams(**cp_kwargs),
        cost_estimate=cost,
    )(*flat_args)

    return out[:, :B, :total_out]


# ---------------------------------------------------------------------------
# Parameter init (deterministic, mirrors the PyTorch module's shapes).
# Weights stored pre-transposed [fan_in, fan_out] in bf16; biases f32.
# ---------------------------------------------------------------------------
def init_fcblock_params(key, in_features, hidden_ch, num_hidden_layers,
                        out_features, last_layer_scale=1.0,
                        weight_dtype=jnp.bfloat16):
    dims = [in_features] + [hidden_ch] * (num_hidden_layers + 1) + [out_features]
    params = []
    keys = jax.random.split(key, len(dims) - 1)
    for i, (fan_in, fan_out) in enumerate(zip(dims[:-1], dims[1:])):
        wk, bk = jax.random.split(keys[i])
        std = math.sqrt(2.0 / fan_in)          # kaiming-normal (fan_in, relu)
        w = std * jax.random.normal(wk, (fan_in, fan_out), dtype=jnp.float32)
        if i == len(dims) - 2:
            w = w * last_layer_scale           # last_hyper_layer_init (* 0.1)
        bound = 1.0 / math.sqrt(fan_in)
        b = jax.random.uniform(bk, (1, fan_out), jnp.float32, -bound, bound)
        params.append((w.astype(weight_dtype), b))
    return params


def init_hyperlinear_params(key, in_ch, out_ch, hyper_in_ch,
                            hyper_num_hidden_layers, hyper_hidden_ch):
    total_out = in_ch * out_ch + out_ch
    fc = init_fcblock_params(key, hyper_in_ch, hyper_hidden_ch,
                             hyper_num_hidden_layers, total_out,
                             last_layer_scale=0.1)
    return {"params": fc, "in_ch": in_ch, "out_ch": out_ch}


# ---------------------------------------------------------------------------
# Forward wrappers
# ---------------------------------------------------------------------------
def _hyper_group_forward(hyper_input, layers, **tile_kwargs):
    """Run L same-shaped HyperLinear layers in a single pallas_call."""
    in_ch, out_ch = layers[0]["in_ch"], layers[0]["out_ch"]
    lead = hyper_input.shape[:-1]
    x2d = hyper_input.reshape((-1, hyper_input.shape[-1]))
    n_params = len(layers[0]["params"])
    stacked = [(jnp.stack([lay["params"][i][0] for lay in layers], axis=0),
                jnp.stack([lay["params"][i][1] for lay in layers], axis=0))
               for i in range(n_params)]
    hypo = fcblock_group_forward_pallas(x2d, stacked, **tile_kwargs)  # [L, B, tot]
    results = []
    for li in range(len(layers)):
        h = hypo[li].reshape(lead + (in_ch * out_ch + out_ch,))
        weights = h[..., : in_ch * out_ch]
        biases = h[..., in_ch * out_ch: in_ch * out_ch + out_ch]
        weights_delta = weights.reshape(lead + (out_ch, in_ch))
        biases_delta = biases.reshape(lead + (1, out_ch))
        results.append([weights_delta, biases_delta])
    return results


def hyperlinear_forward(hyper_input, layer, **tile_kwargs):
    """HyperLinear.forward: [..., hyper_in_ch] -> [weights_delta, biases_delta]."""
    return _hyper_group_forward(hyper_input, [layer], **tile_kwargs)[0]


def init_hyperfc_params(key, in_ch_pos, in_ch_view, out_ch, hyper_in_ch=512,
                        hyper_num_hidden_layers=1, hyper_hidden_ch=64,
                        hidden_ch=128, num_hidden_layers=6):
    """Mirrors HyperFC.__init__ (in_ch_pos / out_ch are unused there too)."""
    make = functools.partial(init_hyperlinear_params,
                             hyper_in_ch=hyper_in_ch,
                             hyper_num_hidden_layers=hyper_num_hidden_layers,
                             hyper_hidden_ch=hyper_hidden_ch)
    n_layers = (num_hidden_layers + 1) if num_hidden_layers == 8 else 1
    keys = jax.random.split(key, n_layers)
    layers, k = [], 0
    if num_hidden_layers == 8:
        layers.append(make(keys[k], in_ch=3, out_ch=hidden_ch)); k += 1
        for _ in range(num_hidden_layers - 1):
            layers.append(make(keys[k], in_ch=hidden_ch, out_ch=hidden_ch)); k += 1
    layers.append(make(keys[k], in_ch=hidden_ch + in_ch_view, out_ch=hidden_ch))
    return layers


def hyperfc_forward(hyper_input, layers, **tile_kwargs):
    """HyperFC.forward: list of [weights_delta, biases_delta] per layer.

    Layers with identical (in_ch, out_ch) — 7 of 9 in the num_hidden_layers=8
    config — are batched into a single pallas_call (leading 'layer' grid axis).
    """
    groups = {}
    for idx, layer in enumerate(layers):
        key = (layer["in_ch"], layer["out_ch"],
               tuple((tuple(w.shape), tuple(b.shape)) for (w, b) in layer["params"]))
        groups.setdefault(key, []).append(idx)
    results = [None] * len(layers)
    for idxs in groups.values():
        group_layers = [layers[i] for i in idxs]
        outs = _hyper_group_forward(hyper_input, group_layers, **tile_kwargs)
        for i, o in zip(idxs, outs):
            results[i] = o
    return results


# ---------------------------------------------------------------------------
# Pure-JAX reference (same bf16-matmul / f32-accumulate numerics).
# ---------------------------------------------------------------------------
def _fcblock_ref(x, params):
    h = x.astype(jnp.float32)
    n = len(params)
    for i, (w, b) in enumerate(params):
        h = jnp.dot(h.astype(jnp.bfloat16), w.astype(jnp.bfloat16),
                    preferred_element_type=jnp.float32) + b.astype(jnp.float32)
        if i < n - 1:
            h = jnp.maximum(h, 0.0)
    return h


def _check_hyperlinear(hyper_input, layer, wd, bd,
                       out_dtype=_DEFAULT_OUT_DTYPE, atol=1e-2, rtol=2e-2):
    in_ch, out_ch = layer["in_ch"], layer["out_ch"]
    lead = hyper_input.shape[:-1]
    ref = _fcblock_ref(hyper_input.reshape((-1, hyper_input.shape[-1])),
                       layer["params"])
    ref = ref.astype(out_dtype).astype(jnp.float32)
    ref = ref.reshape(lead + (in_ch * out_ch + out_ch,))
    ref_w = ref[..., : in_ch * out_ch].reshape(lead + (out_ch, in_ch))
    ref_b = ref[..., in_ch * out_ch:].reshape(lead + (1, out_ch))
    assert wd.shape == ref_w.shape and bd.shape == ref_b.shape
    assert jnp.allclose(wd.astype(jnp.float32), ref_w, atol=atol, rtol=rtol)
    assert jnp.allclose(bd.astype(jnp.float32), ref_b, atol=atol, rtol=rtol)


if __name__ == "__main__":
    key = jax.random.PRNGKey(0)
    pkey, xkey, p2key, x2key = jax.random.split(key, 4)

    # ---- HyperFC at small shapes (num_hidden_layers=8 branch -> 9 layers,
    #      grouped into 3 pallas_calls: 1 + 7(batched) + 1) -------------------
    batch = 2
    hyper_in_ch = 32
    hyper_hidden_ch = 32
    hyper_num_hidden_layers = 1
    hidden_ch = 16
    in_ch_view = 3

    layers = init_hyperfc_params(
        pkey, in_ch_pos=3, in_ch_view=in_ch_view, out_ch=hidden_ch,
        hyper_in_ch=hyper_in_ch, hyper_num_hidden_layers=hyper_num_hidden_layers,
        hyper_hidden_ch=hyper_hidden_ch, hidden_ch=hidden_ch,
        num_hidden_layers=8)
    hyper_input = jax.random.normal(xkey, (batch, hyper_in_ch), dtype=jnp.float32)

    outs = hyperfc_forward(hyper_input, layers)        # default out_dtype=bf16
    jax.block_until_ready(outs)
    for layer, (wd, bd) in zip(layers, outs):
        _check_hyperlinear(hyper_input, layer, wd, bd)

    # ---- single HyperLinear forced onto a multi-tile (1 x 3 x 7) grid -------
    #      (exercises the trunk-cache pl.when path across batch and N tiles,
    #       and the f32 output path)
    layer2 = init_hyperlinear_params(p2key, in_ch=20, out_ch=40,
                                     hyper_in_ch=hyper_in_ch,
                                     hyper_num_hidden_layers=1,
                                     hyper_hidden_ch=hyper_hidden_ch)
    hyper_input2 = jax.random.normal(x2key, (18, hyper_in_ch), dtype=jnp.float32)
    wd2, bd2 = hyperlinear_forward(hyper_input2, layer2, tile_b=8, tile_n=128,
                                   out_dtype=jnp.float32)
    jax.block_until_ready(wd2)
    jax.block_until_ready(bd2)
    _check_hyperlinear(hyper_input2, layer2, wd2, bd2,
                       out_dtype=jnp.float32, atol=2e-3, rtol=2e-3)

    print("KERNEL_OK")
</pallas_src>

<mosaic_0001>
module attributes {stable_mosaic.version = 11 : i64} {
  func.func @_hyper_mlp_kernel(%arg0: i32, %arg1: i32, %arg2: i32, %arg3: memref<8x32xbf16, #tpu.memory_space<vmem>>, %arg4: memref<1x32x32xbf16, #tpu.memory_space<vmem>>, %arg5: memref<1x1x32xf32, #tpu.memory_space<vmem>>, %arg6: memref<1x32x32xbf16, #tpu.memory_space<vmem>>, %arg7: memref<1x1x32xf32, #tpu.memory_space<vmem>>, %arg8: memref<1x32x128xbf16, #tpu.memory_space<vmem>>, %arg9: memref<1x1x128xf32, #tpu.memory_space<vmem>>, %arg10: memref<1x8x128xbf16, #tpu.memory_space<vmem>>, %arg11: memref<8x32xbf16, #tpu.memory_space<vmem>>) attributes {dimension_semantics = [#tpu.dimension_semantics<parallel>, #tpu.dimension_semantics<parallel>, #tpu.dimension_semantics<arbitrary>], iteration_bounds = array<i64: 1, 1, 1>, scalar_prefetch = 0 : i64, scratch_operands = 1 : i64, tpu.core_type = #tpu.core_type<tc>, window_params = [{transform_indices = @transform_0, window_bounds = array<i64: 8, 32>}, {transform_indices = @transform_1, window_bounds = array<i64: 1, 32, 32>}, {transform_indices = @transform_2, window_bounds = array<i64: 1, 1, 32>}, {transform_indices = @transform_3, window_bounds = array<i64: 1, 32, 32>}, {transform_indices = @transform_4, window_bounds = array<i64: 1, 1, 32>}, {transform_indices = @transform_5, window_bounds = array<i64: 1, 32, 128>}, {transform_indices = @transform_6, window_bounds = array<i64: 1, 1, 128>}, {transform_indices = @transform_7, window_bounds = array<i64: 1, 8, 128>}]} {
    %c0_i32 = arith.constant 0 : i32
    %0 = arith.cmpi eq, %arg2, %c0_i32 : i32
    %1 = arith.extui %0 : i1 to i32
    %c0_i32_0 = arith.constant 0 : i32
    %2 = arith.cmpi ne, %1, %c0_i32_0 : i32
    scf.if %2 {
      %c0_11 = arith.constant 0 : index
      %c0_12 = arith.constant 0 : index
      %15 = vector.load %arg3[%c0_11, %c0_12] : memref<8x32xbf16, #tpu.memory_space<vmem>>, vector<8x32xbf16>
      %c0_13 = arith.constant 0 : index
      %c0_14 = arith.constant 0 : index
      %c0_15 = arith.constant 0 : index
      %16 = vector.load %arg4[%c0_13, %c0_14, %c0_15] : memref<1x32x32xbf16, #tpu.memory_space<vmem>>, vector<1x32x32xbf16>
      %17 = vector.shape_cast %16 : vector<1x32x32xbf16> to vector<32x32xbf16>
      %c0_16 = arith.constant 0 : index
      %c0_17 = arith.constant 0 : index
      %c0_18 = arith.constant 0 : index
      %18 = vector.load %arg5[%c0_16, %c0_17, %c0_18] : memref<1x1x32xf32, #tpu.memory_space<vmem>>, vector<1x1x32xf32>
      %19 = vector.shape_cast %18 : vector<1x1x32xf32> to vector<1x32xf32>
      %cst_19 = arith.constant dense<0.000000e+00> : vector<8x32xf32>
      %20 = tpu.matmul %15, %17, %cst_19 {dimension_numbers = #tpu.dot_dimension_numbers<[1], [0], [0], [1], [0, 0, 1, 1], [], []>} : vector<8x32xbf16>, vector<32x32xbf16>, vector<8x32xf32> -> vector<8x32xf32>
      %21 = vector.broadcast %19 : vector<1x32xf32> to vector<8x32xf32>
      %22 = arith.addf %20, %21 : vector<8x32xf32>
      %cst_20 = arith.constant 0.000000e+00 : f32
      %23 = vector.broadcast %cst_20 : f32 to vector<8x32xf32>
      %24 = arith.maximumf %22, %23 : vector<8x32xf32>
      %25 = arith.truncf %24 : vector<8x32xf32> to vector<8x32xbf16>
      %c0_21 = arith.constant 0 : index
      %c0_22 = arith.constant 0 : index
      %c0_23 = arith.constant 0 : index
      %26 = vector.load %arg6[%c0_21, %c0_22, %c0_23] : memref<1x32x32xbf16, #tpu.memory_space<vmem>>, vector<1x32x32xbf16>
      %27 = vector.shape_cast %26 : vector<1x32x32xbf16> to vector<32x32xbf16>
      %c0_24 = arith.constant 0 : index
      %c0_25 = arith.constant 0 : index
      %c0_26 = arith.constant 0 : index
      %28 = vector.load %arg7[%c0_24, %c0_25, %c0_26] : memref<1x1x32xf32, #tpu.memory_space<vmem>>, vector<1x1x32xf32>
      %29 = vector.shape_cast %28 : vector<1x1x32xf32> to vector<1x32xf32>
      %cst_27 = arith.constant dense<0.000000e+00> : vector<8x32xf32>
      %30 = tpu.matmul %25, %27, %cst_27 {dimension_numbers = #tpu.dot_dimension_numbers<[1], [0], [0], [1], [0, 0, 1, 1], [], []>} : vector<8x32xbf16>, vector<32x32xbf16>, vector<8x32xf32> -> vector<8x32xf32>
      %31 = vector.broadcast %29 : vector<1x32xf32> to vector<8x32xf32>
      %32 = arith.addf %30, %31 : vector<8x32xf32>
      %cst_28 = arith.constant 0.000000e+00 : f32
      %33 = vector.broadcast %cst_28 : f32 to vector<8x32xf32>
      %34 = arith.maximumf %32, %33 : vector<8x32xf32>
      %35 = arith.truncf %34 : vector<8x32xf32> to vector<8x32xbf16>
      %c0_29 = arith.constant 0 : index
      %c0_30 = arith.constant 0 : index
      %36 = vector.load %arg11[%c0_29, %c0_30] : memref<8x32xbf16, #tpu.memory_space<vmem>>, vector<8x32xbf16>
      tpu.vector_store %arg11[%c0_29, %c0_30], %35 {strides = array<i32>} : memref<8x32xbf16, #tpu.memory_space<vmem>>, vector<8x32xbf16>,
    } else {
    }
    %c0 = arith.constant 0 : index
    %c0_1 = arith.constant 0 : index
    %3 = vector.load %arg11[%c0, %c0_1] : memref<8x32xbf16, #tpu.memory_space<vmem>>, vector<8x32xbf16>
    %c0_2 = arith.constant 0 : index
    %c0_3 = arith.constant 0 : index
    %c0_4 = arith.constant 0 : index
    %4 = vector.load %arg8[%c0_2, %c0_3, %c0_4] : memref<1x32x128xbf16, #tpu.memory_space<vmem>>, vector<1x32x128xbf16>
    %5 = vector.shape_cast %4 : vector<1x32x128xbf16> to vector<32x128xbf16>
    %cst = arith.constant dense<0.000000e+00> : vector<8x128xf32>
    %6 = tpu.matmul %3, %5, %cst {dimension_numbers = #tpu.dot_dimension_numbers<[1], [0], [0], [1], [0, 0, 1, 1], [], []>} : vector<8x32xbf16>, vector<32x128xbf16>, vector<8x128xf32> -> vector<8x128xf32>
    %c0_5 = arith.constant 0 : index
    %c0_6 = arith.constant 0 : index
    %c0_7 = arith.constant 0 : index
    %7 = vector.load %arg9[%c0_5, %c0_6, %c0_7] : memref<1x1x128xf32, #tpu.memory_space<vmem>>, vector<1x1x128xf32>
    %8 = vector.shape_cast %7 : vector<1x1x128xf32> to vector<1x128xf32>
    %9 = vector.broadcast %8 : vector<1x128xf32> to vector<8x128xf32>
    %10 = arith.addf %6, %9 : vector<8x128xf32>
    %11 = arith.truncf %10 : vector<8x128xf32> to vector<8x128xbf16>
    %c0_8 = arith.constant 0 : index
    %c0_9 = arith.constant 0 : index
    %c0_10 = arith.constant 0 : index
    %12 = vector.load %arg10[%c0_8, %c0_9, %c0_10] : memref<1x8x128xbf16, #tpu.memory_space<vmem>>, vector<1x8x128xbf16>
    %13 = vector.shape_cast %12 : vector<1x8x128xbf16> to vector<8x128xbf16>
    %14 = vector.shape_cast %11 : vector<8x128xbf16> to vector<1x8x128xbf16>
    tpu.vector_store %arg10[%c0_8, %c0_9, %c0_10], %14 {strides = array<i32>} : memref<1x8x128xbf16, #tpu.memory_space<vmem>>, vector<1x8x128xbf16>,
    return
  }
  func.func @transform_0(%arg0: i32, %arg1: i32, %arg2: i32) -> (i32, i32) {
    %c0_i32 = arith.constant 0 : i32
    %c0_i32_0 = arith.constant 0 : i32
    return %arg1, %c0_i32 : i32, i32
  }
  func.func @transform_1(%arg0: i32, %arg1: i32, %arg2: i32) -> (i32, i32, i32) {
    %c0_i32 = arith.constant 0 : i32
    %c0_i32_0 = arith.constant 0 : i32
    %c0_i32_1 = arith.constant 0 : i32
    return %arg0, %c0_i32, %c0_i32_0 : i32, i32, i32
  }
  func.func @transform_2(%arg0: i32, %arg1: i32, %arg2: i32) -> (i32, i32, i32) {
    %c0_i32 = arith.constant 0 : i32
    %c0_i32_0 = arith.constant 0 : i32
    %c0_i32_1 = arith.constant 0 : i32
    return %arg0, %c0_i32, %c0_i32_0 : i32, i32, i32
  }
  func.func @transform_3(%arg0: i32, %arg1: i32, %arg2: i32) -> (i32, i32, i32) {
    %c0_i32 = arith.constant 0 : i32
    %c0_i32_0 = arith.constant 0 : i32
    %c0_i32_1 = arith.constant 0 : i32
    return %arg0, %c0_i32, %c0_i32_0 : i32, i32, i32
  }
  func.func @transform_4(%arg0: i32, %arg1: i32, %arg2: i32) -> (i32, i32, i32) {
    %c0_i32 = arith.constant 0 : i32
    %c0_i32_0 = arith.constant 0 : i32
    %c0_i32_1 = arith.constant 0 : i32
    return %arg0, %c0_i32, %c0_i32_0 : i32, i32, i32
  }
  func.func @transform_5(%arg0: i32, %arg1: i32, %arg2: i32) -> (i32, i32, i32) {
    %c0_i32 = arith.constant 0 : i32
    %c0_i32_0 = arith.constant 0 : i32
    return %arg0, %c0_i32, %arg2 : i32, i32, i32
  }
  func.func @transform_6(%arg0: i32, %arg1: i32, %arg2: i32) -> (i32, i32, i32) {
    %c0_i32 = arith.constant 0 : i32
    %c0_i32_0 = arith.constant 0 : i32
    return %arg0, %c0_i32, %arg2 : i32, i32, i32
  }
  func.func @transform_7(%arg0: i32, %arg1: i32, %arg2: i32) -> (i32, i32, i32) {
    %c0_i32 = arith.constant 0 : i32
    return %arg0, %arg1, %arg2 : i32, i32, i32
  }
}

</mosaic_0001>

<bundles_post_ra>
// kernel: tpu_custom_call.1
= control target key start
LH: loop header
LB: loop body
LE: loop exit
PB: predicated region body
PF: predicated region fallthrough
CT: control target
= control target key end

     0   :  { %12 = vsyncpa [#allocation4], 0  ;;  %s570_s0 = inlined_call_operand.hbm [shape: bf16[8,32], index: 0, kind: input, shape index: {}]   ;;  %s571_s1 = inlined_call_operand.hbm [shape: bf16[1,32,32], index: 1, kind: input, shape index: {}]   ;;  %s572_s2 = inlined_call_operand.vmem [shape: f32[1,1,32], index: 2, kind: input, shape index: {}]   ;;  %s573_s3 = inlined_call_operand.hbm [shape: bf16[1,32,32], index: 3, kind: input, shape index: {}]   ;;  %s574_s4 = inlined_call_operand.vmem [shape: f32[1,1,32], index: 4, kind: input, shape index: {}]   ;;  %s575_s5 = inlined_call_operand.vmem [shape: bf16[1,32,128], index: 5, kind: input, shape index: {}]   ;;  %s576_s6 = inlined_call_operand.vmem [shape: f32[1,1,128], index: 6, kind: input, shape index: {}]   ;;  %s577_s7 = inlined_call_operand.hbm [shape: bf16[1,8,128], index: 7, kind: output, shape index: {}]  }
   0x1   :  { %13 = vsyncpa [#allocation7], 0 }
   0x2   :  { %14 = vsyncpa [#allocation5], 0  ;;  %s450_s24 = smov [#allocation6]   ;;  %s356_s28 = scalar_lea.hbm %s571_s1, 256 }
   0x3   :  { %s30_s25 = sshll.u32 %s450_s24, 4  ;;  %p357_p0 = scmp.ne.s32.totalorder %s571_s1, %s356_s28  ;;  %s31_s25 = int_to_ptr.vmem [resolvable:$true] %s30_s25 }
   0x4   :  { %p360_p1 = scmp.lt.u32.totalorder %s356_s28, %s571_s1 }
   0x6   :  { %p362_p2 = pnand %p360_p1, %p357_p0 }
   0x8   :  { %365 = shalt.err (!%p362_p2)
}
   0x9   :  { %s366_s10 = scalar_lea.vmem %s31_s25, 256  ;;  %p371_p4 = scmp.lt.s32.totalorder %s31_s25, %s31_s25 }
   0xa   :  { %p367_p3 = scmp.ne.s32.totalorder %s31_s25, %s366_s10  ;;  %p372_p5 = scmp.lt.s32.totalorder %s366_s10, %s366_s10 }
   0xc   :  { %p373_p6 = por %p372_p5, %p371_p4 }
   0xe   :  { %p374_p7 = pnand %p373_p6, %p367_p3 }
  0x10   :  { %377 = shalt.err (!%p374_p7)
}
  0x11   :  { %s451_s11 = smov 64   ;;  %s452_s12 = smov 4  }
  0x12   :  { %36 = dma.hbm_to_vmem [thread:$0]  %s571_s1, 256, %s31_s25, [#allocation7], %s451_s11, %s451_s11, %s452_s12  }
  0x13   :  { %s453_s15 = smov [#allocation3]   ;;  %s454_s17 = smov [#allocation8]  }
  0x14   :  { %s21_s16 = sshll.u32 %s453_s15, 4  ;;  %s44_s18 = sshll.u32 %s454_s17, 4  ;;  %s22_s16 = int_to_ptr.vmem [resolvable:$true] %s21_s16  ;;  %s45_s18 = int_to_ptr.vmem [resolvable:$true] %s44_s18 }
  0x15   :  { %s378_s21 = scalar_lea.hbm %s570_s0, 64 }
  0x16   :  { %p379_p8 = scmp.ne.s32.totalorder %s570_s0, %s378_s21  ;;  %p382_p9 = scmp.lt.u32.totalorder %s378_s21, %s570_s0 }
  0x18   :  { %p384_p10 = pnand %p382_p9, %p379_p8 }
  0x1a   :  { %387 = shalt.err (!%p384_p10)
}
  0x1b   :  { %s388_s1 = scalar_lea.vmem %s22_s16, 64  ;;  %p393_p12 = scmp.lt.s32.totalorder %s22_s16, %s22_s16 }
  0x1c   :  { %p389_p11 = scmp.ne.s32.totalorder %s22_s16, %s388_s1  ;;  %p394_p13 = scmp.lt.s32.totalorder %s388_s1, %s388_s1 }
  0x1e   :  { %p395_p0 = por %p394_p13, %p393_p12 }
  0x20   :  { %p396_p1 = pnand %p395_p0, %p389_p11 }
  0x22   :  { %399 = shalt.err (!%p396_p1)
}
  0x23   :  { %24 = dma.hbm_to_vmem [thread:$0]  %s570_s0, 64, %s22_s16, [#allocation4]  }
  0x24   :  { %s400_s30 = scalar_lea.hbm %s573_s3, 256 }
  0x25   :  { %p401_p2 = scmp.ne.s32.totalorder %s573_s3, %s400_s30  ;;  %p404_p3 = scmp.lt.u32.totalorder %s400_s30, %s573_s3 }
  0x27   :  { %p406_p4 = pnand %p404_p3, %p401_p2 }
  0x29   :  { %409 = shalt.err (!%p406_p4)
}
  0x2a   :  { %s410_s14 = scalar_lea.vmem %s45_s18, 256  ;;  %p415_p6 = scmp.lt.s32.totalorder %s45_s18, %s45_s18 }
  0x2b   :  { %p411_p5 = scmp.ne.s32.totalorder %s45_s18, %s410_s14  ;;  %p416_p7 = scmp.lt.s32.totalorder %s410_s14, %s410_s14 }
  0x2d   :  { %p417_p8 = por %p416_p7, %p415_p6 }
  0x2f   :  { %p418_p9 = pnand %p417_p8, %p411_p5 }
  0x31   :  { %421 = shalt.err (!%p418_p9)
}
  0x32   :  { %50 = dma.hbm_to_vmem [thread:$0]  %s573_s3, 256, %s45_s18, [#allocation7], %s451_s11, %s451_s11, %s452_s12  }
  0x33   :  { %444 = dma.done.wait [#allocation4], 64  }
  0x34   :  { %445 = vsyncadd [#allocation4], 4294967232 }
  0x35   :  { %446 = dma.done.wait [#allocation7], 512  }
  0x36   :  { %447 = vsyncadd [#allocation7], 4294966784  ;;  %v455_v0 = vmov 0.0   ;;  %vm456_vm0 = vmmov 0   ;;  %v350_v1 = vld [vmem:[#allocation6] sm:$0xff]   ;;  %v351_v2 = vld [vmem:[#allocation6 + $0x8] sm:$0xff]  }
  0x37   :  { %318 = vmatprep.subr.bf16.mxu0 %v455_v0  ;;  %322 = vmatprep.mubr.msk.bf16.mxu0 %vm456_vm0, %v455_v0  ;;  %v71_v3 = vld [vmem:[#allocation3] sm:$0xf]  ;;  %vm95_vm1 = vcmask 261120   ;;  %v352_v4 = vld [vmem:[#allocation8] sm:$0xff]   ;;  %v297_v6 = vld [vmem:[%s572_s2] ss:$0 sm:$0xff] }
  0x38   :  { %326 = vmatprep.subr.bf16.mxu1 %v455_v0  ;;  %330 = vmatprep.mubr.msk.bf16.mxu1 %vm456_vm0, %v455_v0  ;;  %v353_v5 = vld [vmem:[#allocation8 + $0x8] sm:$0xff]   ;;  %v354_v14 = vld [vmem:[%s575_s5] sm:$0xff]   ;;  %v355_v15 = vld [vmem:[%s575_s5 + $0x8] sm:$0xff]   ;;  %vm209_vm2 = vcmask 257024   ;;  %s457_s21 = smov [#allocation9]  }
  0x39   :  { %319 = vmatpush3.bf16.msra.mxu0 %v350_v1  ;;  %327 = vmatpush3.bf16.msra.mxu1 %v352_v4  ;;  %v301_v16 = vld [vmem:[%s574_s4] ss:$0 sm:$0xff]  ;;  %s287_s22 = sshll.u32 %s457_s21, 4  ;;  %s288_s22 = int_to_ptr.vmem [resolvable:$true] %s287_s22 }
  0x3a   :  { %320 = vmatprep.subr.bf16.mxu0 %v455_v0  ;;  %328 = vmatprep.subr.bf16.mxu1 %v455_v0  ;;  %v305_v25 = vld [vmem:[%s576_s6] ss:$0 sm:$0xff]  ;;  %s422_s4 = scalar_lea.vmem %s288_s22, 64  ;;  %p427_p11 = scmp.lt.s32.totalorder %s288_s22, %s288_s22 }
  0x3b   :  { %p423_p10 = scmp.ne.s32.totalorder %s288_s22, %s422_s4  ;;  %p428_p12 = scmp.lt.s32.totalorder %s422_s4, %s422_s4 }
  0x3d   :  { %321 = vmatpush3.bf16.msra.mxu0 %v351_v2  ;;  %329 = vmatpush3.bf16.msra.mxu1 %v353_v5  ;;  %p429_p13 = por %p428_p12, %p427_p11 }
  0x3e   :  { %334 = vmatprep.subr.bf16.mxu0 %v455_v0 }
  0x3f   :  { %p430_p0 = pnand %p429_p13, %p423_p10 }
  0x40   :  { %323 = vmatmul.mubr.msk.bf16.vlgmr.msra.gmra.mrb[0].mxu0 %vm95_vm1, %v71_v3 }
  0x41   :  { %338 = vmatprep.mubr.msk.bf16.mxu0 %vm456_vm0, %v455_v0  ;;  %335 = vmatpush3.bf16.msra.mxu0 %v354_v14 }
  0x42   :  { %336 = vmatprep.subr.bf16.mxu0 %v455_v0 }
  0x45   :  { %337 = vmatpush3.bf16.msra.mxu0 %v355_v15 }
 0x113   :  { %v133_v7 = vpop.f32.mrb[0].mxu0 }
 0x114   :  { %v134_v8 = vadd.f32 %v297_v6, %v133_v7  ;;  %v324_v9 = vpop.f32.mrb[1].mxu0 }
 0x115   :  { %v136_v10 = vpop.f32.mrb[2].mxu0 }
 0x116   :  { %v139_v11 = vmax.f32 %v134_v8, 0.0  ;;  %v325_v12 = vpop.f32.mrb[3].mxu0 }
 0x118   :  { %v140_v13 = vpack.c.bf16 %v139_v11, %v139_v11 }
 0x11a   :  { %331 = vmatmul.mubr.msk.bf16.vlgmr.msra.gmra.mrb[0].mxu1 %vm95_vm1, %v140_v13 }
 0x1ed   :  { %v201_v17 = vpop.f32.mrb[0].mxu1 }
 0x1ee   :  { %v202_v18 = vadd.f32 %v301_v16, %v201_v17  ;;  %v332_v19 = vpop.f32.mrb[1].mxu1 }
 0x1ef   :  { %v204_v20 = vpop.f32.mrb[2].mxu1 }
 0x1f0   :  { %v207_v21 = vmax.f32 %v202_v18, 0.0  ;;  %v333_v22 = vpop.f32.mrb[3].mxu1 }
 0x1f2   :  { %v208_v23 = vpack.c.bf16 %v207_v21, %v207_v21 }
 0x1f4   :  { %210 = vst.msk [vmem:[#allocation2] sm:$0xf] %vm209_vm2, %v208_v23 }
 0x1fb   :  { %v211_v24 = vld [vmem:[#allocation2] sm:$0xf] }
 0x1fc   :  { %339 = vmatmul.mubr.msk.bf16.vlgmr.msra.gmra.mrb[4].mxu0 %vm95_vm1, %v211_v24 }
 0x2cf   :  { %v273_v26 = vpop.f32.mrb[4].mxu0 }
 0x2d0   :  { %v274_v27 = vadd.f32 %v305_v25, %v273_v26  ;;  %v340_v28 = vpop.f32.mrb[5].mxu0 }
 0x2d1   :  { %v276_v29 = vpop.f32.mrb[6].mxu0 }
 0x2d2   :  { %v279_v30 = vpack.c.bf16 %v274_v27, %v274_v27  ;;  %v341_v31 = vpop.f32.mrb[7].mxu0 }
 0x2d4   :  { %280 = vst [vmem:[#allocation9] sm:$0xf] %v279_v30 }
 0x2d5   :  { %433 = shalt.err (!%p430_p0)
}
 0x2d6   :  { %s434_s6 = scalar_lea.hbm %s577_s7, 64 }
 0x2d7   :  { %p435_p1 = scmp.ne.s32.totalorder %s577_s7, %s434_s6  ;;  %p438_p2 = scmp.lt.u32.totalorder %s434_s6, %s577_s7 }
 0x2d9   :  { %p440_p3 = pnand %p438_p2, %p435_p1 }
 0x2db   :  { %443 = shalt.err (!%p440_p3)
}
 0x2dc   :  { %290 = dma.vmem_to_hbm [thread:$0]  %s288_s22, 64, %s577_s7, [#allocation5]  }
 0x2dd   :  { %448 = dma.done.wait [#allocation5], 64  }
 0x2de   :  { %449 = vsyncadd [#allocation5], 4294967232 }
 0x2df   :  { %294 = vsyncpa [#allocation4], 1 }
 0x2e0   :  { %295 = vsyncpa [#allocation7], 1 }
 0x2e1   :  { %296 = vsyncpa [#allocation5], 1 }

</bundles_post_ra>
